<compile_context>
chip_gen: v7x
topology: tpu7x:2x2x1
jax: 0.10.0
libtpu: 0.0.40
codegen_flags: <defaults>
</compile_context>

<pallas_src>
import functools
import math

import jax
import jax.numpy as jnp
from jax.experimental import pallas as pl
from jax.experimental.pallas import tpu as pltpu


def _round_up(x, m):
    return ((x + m - 1) // m) * m


def _cdiv(a, b):
    return (a + b - 1) // b


def _pick_tile(dim, candidates=(512, 256, 128)):
    for c in candidates:
        if dim % c == 0:
            return c
    return dim  # dims are padded to multiples of 128, so 128 always divides


def _chip_info():
    """Best-effort chip detection: bf16 VPU availability and VMEM capacity."""
    kind = jax.devices()[0].device_kind.lower()
    bf16_epilogue = ("v6" in kind) or ("v7" in kind)
    try:
        vmem_capacity = int(pltpu.get_tpu_info().vmem_capacity_bytes)
    except Exception:
        vmem_capacity = (64 << 20) if "v7" in kind else (128 << 20)
    return bf16_epilogue, vmem_capacity


def _choose_batch_tile(batch, max_tile):
    """Multiple-of-16 tile that divides the padded batch nearly evenly and
    gives >= 2 grid steps whenever the batch allows it (megacore on v7x)."""
    rb = _round_up(max(batch, 1), 16)
    if rb <= 16:
        return 16, 16
    cap = min(max_tile, _round_up(_cdiv(rb, 2), 16))
    num_tiles = _cdiv(rb, cap)
    bt = _round_up(_cdiv(rb, num_tiles), 16)
    num_tiles = _cdiv(rb, bt)
    return bt, bt * num_tiles


# ----------------------------------------------------------------------------
# Fused kernel: all (padded, bf16) weights resident in VMEM (single-buffered);
# grid tiles only the batch dimension.
# ----------------------------------------------------------------------------
def _mlp_fused_kernel(num_hidden_layers, bf16_epilogue, x_ref, *refs):
    out_ref = refs[-1]
    param_refs = refs[:-1]
    h = x_ref[...].astype(jnp.bfloat16)          # in-kernel cast (VPU, hidden under MXU)
    for layer in range(num_hidden_layers + 1):
        w_ref = param_refs[2 * layer]            # bf16 (in_pad, out_pad)
        b_ref = param_refs[2 * layer + 1]        # bf16 or f32 (1, out_pad)
        acc = jnp.dot(h, w_ref[...], preferred_element_type=jnp.float32)
        last = layer == num_hidden_layers
        if bf16_epilogue:
            acc = acc.astype(jnp.bfloat16) + b_ref[...]
            if last:
                out_ref[...] = acc.astype(out_ref.dtype)
            else:
                h = jnp.maximum(acc, 0)
        else:
            acc = acc + b_ref[...]
            if last:
                out_ref[...] = acc.astype(out_ref.dtype)
            else:
                h = jnp.maximum(acc, 0.0).astype(jnp.bfloat16)


# ----------------------------------------------------------------------------
# Streaming fallback kernel: one Linear(+ReLU) as a tiled matmul with a
# K-reduction grid axis (weights streamed from HBM instead of resident).
# ----------------------------------------------------------------------------
def _linear_stream_kernel(apply_relu, bf16_epilogue, x_ref, w_ref, b_ref, o_ref, acc_ref):
    @pl.when(pl.program_id(2) == 0)
    def _():
        acc_ref[...] = jnp.zeros_like(acc_ref)

    acc_ref[...] += jnp.dot(x_ref[...].astype(jnp.bfloat16), w_ref[...],
                            preferred_element_type=jnp.float32)

    @pl.when(pl.program_id(2) == pl.num_programs(2) - 1)
    def _():
        acc = acc_ref[...]
        if bf16_epilogue:
            acc = acc.astype(jnp.bfloat16) + b_ref[...]
        else:
            acc = acc + b_ref[...]
        if apply_relu:
            acc = jnp.maximum(acc, 0)
        o_ref[...] = acc.astype(o_ref.dtype)


def _streaming_linear(h, w_p, b_p, *, bt, apply_relu, bf16_epilogue, vmem_budget):
    pb, din = h.shape
    dout = w_p.shape[1]
    tk = _pick_tile(din)
    tn = _pick_tile(dout)
    grid = (pb // bt, dout // tn, din // tk)
    kernel = functools.partial(_linear_stream_kernel, apply_relu, bf16_epilogue)
    flops = 2 * pb * din * dout
    bytes_accessed = (pb * din * h.dtype.itemsize + int(w_p.size) * 2
                      + int(b_p.size) * b_p.dtype.itemsize + pb * dout * 2)
    vmem_needed = (2 * bt * tk * h.dtype.itemsize   # double-buffered input tile
                   + 2 * tk * tn * 2                # double-buffered weight tile
                   + 2 * bt * tn * 2                # double-buffered output tile
                   + bt * tn * 4                    # f32 accumulator scratch
                   + (2 << 20))
    return pl.pallas_call(
        kernel,
        out_shape=jax.ShapeDtypeStruct((pb, dout), jnp.bfloat16),
        grid=grid,
        in_specs=[pl.BlockSpec((bt, tk), lambda i, j, k: (i, k)),
                  pl.BlockSpec((tk, tn), lambda i, j, k: (k, j)),
                  pl.BlockSpec((1, tn), lambda i, j, k: (0, j))],
        out_specs=pl.BlockSpec((bt, tn), lambda i, j, k: (i, j)),
        scratch_shapes=[pltpu.VMEM((bt, tn), jnp.float32)],
        compiler_params=pltpu.CompilerParams(
            dimension_semantics=("parallel", "parallel", "arbitrary"),
            vmem_limit_bytes=int(min(vmem_budget, max(32 << 20, vmem_needed)))),
        cost_estimate=pl.CostEstimate(flops=int(flops), transcendentals=0,
                                      bytes_accessed=int(bytes_accessed)),
    )(h, w_p, b_p)


# ----------------------------------------------------------------------------
# Forward (jit-compiled; all padding / slicing fuses around the custom call).
# flat_params are the pre-padded, pre-cast parameters built once at init.
# ----------------------------------------------------------------------------
def _mlp_forward(x, flat_params, *, num_hidden_layers, input_dim, output_dim,
                 pad_dims, bf16_epilogue, max_batch_tile, vmem_capacity,
                 force_streaming=False):
    batch = x.shape[0]
    bt, padded_batch = _choose_batch_tile(batch, max_batch_tile)
    x_p = jnp.pad(x, ((0, padded_batch - batch), (0, pad_dims[0] - input_dim)))

    num_layers = num_hidden_layers + 1
    param_bytes = sum(int(p.size) * p.dtype.itemsize for p in flat_params)
    max_pd = max(pad_dims)
    # VMEM demand of the fused resident-weight path (Buffered(1) params +
    # double-buffered activation tiles + in-kernel f32/bf16 temporaries).
    vmem_needed = (param_bytes
                   + 2 * bt * pad_dims[0] * 4
                   + 2 * bt * pad_dims[-1] * 2
                   + 2 * bt * max_pd * 6
                   + (2 << 20))
    vmem_budget = int(0.85 * vmem_capacity)

    if force_streaming or vmem_needed > vmem_budget:
        # Weight-streaming fallback: per-layer tiled matmul, weights never resident.
        # TODO(synk): could fuse layers with pltpu.emit_pipeline for fewer HBM round-trips.
        h = x_p
        for layer in range(num_layers):
            h = _streaming_linear(h, flat_params[2 * layer], flat_params[2 * layer + 1],
                                  bt=bt, apply_relu=layer < num_hidden_layers,
                                  bf16_epilogue=bf16_epilogue, vmem_budget=vmem_budget)
        out_p = h
    else:
        in_specs = [pl.BlockSpec((bt, pad_dims[0]), lambda i: (i, 0))]
        for layer in range(num_layers):
            w_shape = (pad_dims[layer], pad_dims[layer + 1])
            b_shape = (1, pad_dims[layer + 1])
            # Constant index map -> single-buffer the resident params.
            in_specs.append(pl.BlockSpec(w_shape, lambda i: (0, 0),
                                         pipeline_mode=pl.Buffered(1)))
            in_specs.append(pl.BlockSpec(b_shape, lambda i: (0, 0),
                                         pipeline_mode=pl.Buffered(1)))
        out_spec = pl.BlockSpec((bt, pad_dims[-1]), lambda i: (i, 0))

        flops = 2 * padded_batch * sum(pad_dims[i] * pad_dims[i + 1]
                                       for i in range(num_layers))
        bytes_accessed = (padded_batch * pad_dims[0] * 4 + param_bytes
                          + padded_batch * pad_dims[-1] * 2)
        kernel = functools.partial(_mlp_fused_kernel, num_hidden_layers, bf16_epilogue)
        out_p = pl.pallas_call(
            kernel,
            out_shape=jax.ShapeDtypeStruct((padded_batch, pad_dims[-1]), jnp.bfloat16),
            grid=(padded_batch // bt,),
            in_specs=in_specs,
            out_specs=out_spec,
            compiler_params=pltpu.CompilerParams(
                dimension_semantics=("parallel",),
                vmem_limit_bytes=int(min(vmem_budget, max(32 << 20, vmem_needed)))),
            cost_estimate=pl.CostEstimate(flops=int(flops), transcendentals=0,
                                          bytes_accessed=int(bytes_accessed)),
        )(x_p, *flat_params)

    return out_p[:batch, :output_dim].astype(jnp.float32)


# ----------------------------------------------------------------------------
# Parameter construction mirroring DynamicNN.__init__ (nn.Linear defaults:
# uniform(-1/sqrt(fan_in), 1/sqrt(fan_in)) for weight and bias).
# Weights stored as (in_features, out_features) (PyTorch W transposed).
# ----------------------------------------------------------------------------
def init_dynamic_nn_params(key, input_dim, num_hidden_layers,
                           hidden_dimension, output_dimension):
    dims = [input_dim] + [hidden_dimension] * num_hidden_layers + [output_dimension]
    params = []
    for i in range(len(dims) - 1):
        fan_in, fan_out = dims[i], dims[i + 1]
        key, kw, kb = jax.random.split(key, 3)
        bound = 1.0 / math.sqrt(fan_in)
        w = jax.random.uniform(kw, (fan_in, fan_out), jnp.float32, -bound, bound)
        b = jax.random.uniform(kb, (1, fan_out), jnp.float32, -bound, bound)
        params.append((w, b))
    return params


class AudioAttWrapperPallas:
    """JAX/Pallas equivalent of AudioAtt_wrapper's forward pass.

    forward only consumes data['input_values'] (batch, input_dim); the MLP
    (DynamicNN) is what the kernel implements.
    """
    # TODO(synk): Attributes_Processor / Embedding_Processor (tokenize path) are
    # data-preprocessing classes with no definition provided; the forward pass
    # only consumes their output, so input_dim is taken directly.

    def __init__(self, input_dim, num_hidden_layers, hidden_dimension,
                 output_dimension, key):
        self.num_hidden_layers = num_hidden_layers
        self.input_dim = input_dim
        self.output_dim = output_dimension
        self.params = init_dynamic_nn_params(
            key, input_dim, num_hidden_layers, hidden_dimension, output_dimension)

        self.bf16_epilogue, vmem_capacity = _chip_info()
        max_batch_tile = 512 if vmem_capacity >= (100 << 20) else 256

        dims = [input_dim] + [w.shape[1] for w, _ in self.params]
        pad_dims = tuple(_round_up(d, 128) for d in dims)  # lane-dense feature dims
        self.pad_dims = pad_dims

        # Hoisted once: pad + cast parameters (weights bf16; biases bf16 on
        # v6e/v7x, f32 on v5e).  Cached -> no per-forward parameter traffic.
        bias_dtype = jnp.bfloat16 if self.bf16_epilogue else jnp.float32
        flat = []
        for li, (w, b) in enumerate(self.params):
            w_p = jnp.zeros((pad_dims[li], pad_dims[li + 1]), jnp.bfloat16)
            w_p = w_p.at[: w.shape[0], : w.shape[1]].set(w.astype(jnp.bfloat16))
            b_p = jnp.zeros((1, pad_dims[li + 1]), bias_dtype)
            b_p = b_p.at[:, : b.shape[1]].set(b.astype(bias_dtype))
            flat.extend([w_p, b_p])
        self.flat_params = tuple(jax.device_put(p) for p in flat)

        cfg = dict(num_hidden_layers=num_hidden_layers, input_dim=input_dim,
                   output_dim=output_dimension, pad_dims=pad_dims,
                   bf16_epilogue=self.bf16_epilogue, max_batch_tile=max_batch_tile,
                   vmem_capacity=vmem_capacity)
        self._fwd = jax.jit(functools.partial(_mlp_forward, **cfg))
        self._fwd_streaming = jax.jit(functools.partial(_mlp_forward,
                                                        force_streaming=True, **cfg))

    def __call__(self, data):
        x = data["input_values"]
        return {"sentence_embedding": self._fwd(x, self.flat_params)}


# Pure-JAX reference with the same dtype choices as the kernels.
def mlp_reference(x, params, num_hidden_layers, bf16_epilogue):
    h = x.astype(jnp.bfloat16)
    n = len(params)
    for i, (w, b) in enumerate(params):
        acc = jnp.dot(h, w.astype(jnp.bfloat16), preferred_element_type=jnp.float32)
        last = i == n - 1
        if bf16_epilogue:
            acc = acc.astype(jnp.bfloat16) + b.astype(jnp.bfloat16)
            if last:
                return acc.astype(jnp.float32)
            h = jnp.maximum(acc, 0)
        else:
            acc = acc + b
            if last:
                return acc.astype(jnp.bfloat16).astype(jnp.float32)
            h = jnp.maximum(acc, 0.0).astype(jnp.bfloat16)


if __name__ == "__main__":
    key = jax.random.PRNGKey(0)
    k_param, k_x = jax.random.split(key)

    # Small shapes consistent with the module.
    batch = 8
    input_dim = 32          # processor.get_input_dim()
    num_hidden_layers = 2
    hidden_dimension = 32
    output_dimension = 16

    model = AudioAttWrapperPallas(input_dim, num_hidden_layers, hidden_dimension,
                                  output_dimension, k_param)

    x = jax.random.normal(k_x, (batch, input_dim), jnp.float32)
    data = {"input_values": x}

    out = model(data)["sentence_embedding"]
    out = jax.block_until_ready(out)

    ref = mlp_reference(x, model.params, num_hidden_layers, model.bf16_epilogue)
    assert out.shape == (batch, output_dimension)
    assert jnp.allclose(out, ref, atol=1e-2, rtol=1e-2), "fused path mismatch vs reference"

    # Also exercise the weight-streaming fallback (used when resident weights
    # would exceed the chip's VMEM budget) to make sure it stays correct.
    out_s = jax.block_until_ready(model._fwd_streaming(x, model.flat_params))
    assert jnp.allclose(out_s, ref, atol=1e-2, rtol=1e-2), "streaming path mismatch vs reference"

    print("KERNEL_OK")
</pallas_src>

<mosaic_0001>
module attributes {stable_mosaic.version = 11 : i64} {
  func.func @_mlp_fused_kernel(%arg0: i32, %arg1: memref<16x128xf32, #tpu.memory_space<vmem>>, %arg2: memref<128x128xbf16, #tpu.memory_space<vmem>>, %arg3: memref<1x128xf32, #tpu.memory_space<vmem>>, %arg4: memref<128x128xbf16, #tpu.memory_space<vmem>>, %arg5: memref<1x128xf32, #tpu.memory_space<vmem>>, %arg6: memref<128x128xbf16, #tpu.memory_space<vmem>>, %arg7: memref<1x128xf32, #tpu.memory_space<vmem>>, %arg8: memref<16x128xbf16, #tpu.memory_space<vmem>>) attributes {dimension_semantics = [#tpu.dimension_semantics<parallel>], iteration_bounds = array<i64: 1>, scalar_prefetch = 0 : i64, scratch_operands = 0 : i64, tpu.core_type = #tpu.core_type<tc>, window_params = [{transform_indices = @transform_0, window_bounds = array<i64: 16, 128>}, {pipeline_mode = #tpu.pipeline_mode<synchronous>, transform_indices = @transform_1, window_bounds = array<i64: 128, 128>}, {pipeline_mode = #tpu.pipeline_mode<synchronous>, transform_indices = @transform_2, window_bounds = array<i64: 1, 128>}, {pipeline_mode = #tpu.pipeline_mode<synchronous>, transform_indices = @transform_3, window_bounds = array<i64: 128, 128>}, {pipeline_mode = #tpu.pipeline_mode<synchronous>, transform_indices = @transform_4, window_bounds = array<i64: 1, 128>}, {pipeline_mode = #tpu.pipeline_mode<synchronous>, transform_indices = @transform_5, window_bounds = array<i64: 128, 128>}, {pipeline_mode = #tpu.pipeline_mode<synchronous>, transform_indices = @transform_6, window_bounds = array<i64: 1, 128>}, {transform_indices = @transform_7, window_bounds = array<i64: 16, 128>}]} {
    %c0 = arith.constant 0 : index
    %c0_0 = arith.constant 0 : index
    %0 = vector.load %arg1[%c0, %c0_0] : memref<16x128xf32, #tpu.memory_space<vmem>>, vector<16x128xf32>
    %1 = arith.truncf %0 : vector<16x128xf32> to vector<16x128xbf16>
    %c0_1 = arith.constant 0 : index
    %c0_2 = arith.constant 0 : index
    %2 = vector.load %arg2[%c0_1, %c0_2] : memref<128x128xbf16, #tpu.memory_space<vmem>>, vector<128x128xbf16>
    %cst = arith.constant dense<0.000000e+00> : vector<16x128xf32>
    %3 = tpu.matmul %1, %2, %cst {dimension_numbers = #tpu.dot_dimension_numbers<[1], [0], [0], [1], [0, 0, 1, 1], [], []>} : vector<16x128xbf16>, vector<128x128xbf16>, vector<16x128xf32> -> vector<16x128xf32>
    %c0_3 = arith.constant 0 : index
    %c0_4 = arith.constant 0 : index
    %4 = vector.load %arg3[%c0_3, %c0_4] : memref<1x128xf32, #tpu.memory_space<vmem>>, vector<1x128xf32>
    %5 = vector.broadcast %4 : vector<1x128xf32> to vector<16x128xf32>
    %6 = arith.addf %3, %5 : vector<16x128xf32>
    %cst_5 = arith.constant 0.000000e+00 : f32
    %7 = vector.broadcast %cst_5 : f32 to vector<16x128xf32>
    %8 = arith.maximumf %6, %7 : vector<16x128xf32>
    %9 = arith.truncf %8 : vector<16x128xf32> to vector<16x128xbf16>
    %c0_6 = arith.constant 0 : index
    %c0_7 = arith.constant 0 : index
    %10 = vector.load %arg4[%c0_6, %c0_7] : memref<128x128xbf16, #tpu.memory_space<vmem>>, vector<128x128xbf16>
    %cst_8 = arith.constant dense<0.000000e+00> : vector<16x128xf32>
    %11 = tpu.matmul %9, %10, %cst_8 {dimension_numbers = #tpu.dot_dimension_numbers<[1], [0], [0], [1], [0, 0, 1, 1], [], []>} : vector<16x128xbf16>, vector<128x128xbf16>, vector<16x128xf32> -> vector<16x128xf32>
    %c0_9 = arith.constant 0 : index
    %c0_10 = arith.constant 0 : index
    %12 = vector.load %arg5[%c0_9, %c0_10] : memref<1x128xf32, #tpu.memory_space<vmem>>, vector<1x128xf32>
    %13 = vector.broadcast %12 : vector<1x128xf32> to vector<16x128xf32>
    %14 = arith.addf %11, %13 : vector<16x128xf32>
    %cst_11 = arith.constant 0.000000e+00 : f32
    %15 = vector.broadcast %cst_11 : f32 to vector<16x128xf32>
    %16 = arith.maximumf %14, %15 : vector<16x128xf32>
    %17 = arith.truncf %16 : vector<16x128xf32> to vector<16x128xbf16>
    %c0_12 = arith.constant 0 : index
    %c0_13 = arith.constant 0 : index
    %18 = vector.load %arg6[%c0_12, %c0_13] : memref<128x128xbf16, #tpu.memory_space<vmem>>, vector<128x128xbf16>
    %cst_14 = arith.constant dense<0.000000e+00> : vector<16x128xf32>
    %19 = tpu.matmul %17, %18, %cst_14 {dimension_numbers = #tpu.dot_dimension_numbers<[1], [0], [0], [1], [0, 0, 1, 1], [], []>} : vector<16x128xbf16>, vector<128x128xbf16>, vector<16x128xf32> -> vector<16x128xf32>
    %c0_15 = arith.constant 0 : index
    %c0_16 = arith.constant 0 : index
    %20 = vector.load %arg7[%c0_15, %c0_16] : memref<1x128xf32, #tpu.memory_space<vmem>>, vector<1x128xf32>
    %21 = vector.broadcast %20 : vector<1x128xf32> to vector<16x128xf32>
    %22 = arith.addf %19, %21 : vector<16x128xf32>
    %23 = arith.truncf %22 : vector<16x128xf32> to vector<16x128xbf16>
    %c0_17 = arith.constant 0 : index
    %c0_18 = arith.constant 0 : index
    %24 = vector.load %arg8[%c0_17, %c0_18] : memref<16x128xbf16, #tpu.memory_space<vmem>>, vector<16x128xbf16>
    tpu.vector_store %arg8[%c0_17, %c0_18], %23 {strides = array<i32>} : memref<16x128xbf16, #tpu.memory_space<vmem>>, vector<16x128xbf16>,
    return
  }
  func.func @transform_0(%arg0: i32) -> (i32, i32) {
    %c0_i32 = arith.constant 0 : i32
    %c0_i32_0 = arith.constant 0 : i32
    return %arg0, %c0_i32 : i32, i32
  }
  func.func @transform_1(%arg0: i32) -> (i32, i32) {
    %c0_i32 = arith.constant 0 : i32
    %c0_i32_0 = arith.constant 0 : i32
    %c0_i32_1 = arith.constant 0 : i32
    return %c0_i32, %c0_i32_0 : i32, i32
  }
  func.func @transform_2(%arg0: i32) -> (i32, i32) {
    %c0_i32 = arith.constant 0 : i32
    %c0_i32_0 = arith.constant 0 : i32
    %c0_i32_1 = arith.constant 0 : i32
    return %c0_i32, %c0_i32_0 : i32, i32
  }
  func.func @transform_3(%arg0: i32) -> (i32, i32) {
    %c0_i32 = arith.constant 0 : i32
    %c0_i32_0 = arith.constant 0 : i32
    %c0_i32_1 = arith.constant 0 : i32
    return %c0_i32, %c0_i32_0 : i32, i32
  }
  func.func @transform_4(%arg0: i32) -> (i32, i32) {
    %c0_i32 = arith.constant 0 : i32
    %c0_i32_0 = arith.constant 0 : i32
    %c0_i32_1 = arith.constant 0 : i32
    return %c0_i32, %c0_i32_0 : i32, i32
  }
  func.func @transform_5(%arg0: i32) -> (i32, i32) {
    %c0_i32 = arith.constant 0 : i32
    %c0_i32_0 = arith.constant 0 : i32
    %c0_i32_1 = arith.constant 0 : i32
    return %c0_i32, %c0_i32_0 : i32, i32
  }
  func.func @transform_6(%arg0: i32) -> (i32, i32) {
    %c0_i32 = arith.constant 0 : i32
    %c0_i32_0 = arith.constant 0 : i32
    %c0_i32_1 = arith.constant 0 : i32
    return %c0_i32, %c0_i32_0 : i32, i32
  }
  func.func @transform_7(%arg0: i32) -> (i32, i32) {
    %c0_i32 = arith.constant 0 : i32
    %c0_i32_0 = arith.constant 0 : i32
    return %arg0, %c0_i32 : i32, i32
  }
}

</mosaic_0001>

<bundles_post_ra>
// kernel: _mlp_forward.1
= control target key start
LH: loop header
LB: loop body
LE: loop exit
PB: predicated region body
PF: predicated region fallthrough
CT: control target
= control target key end

     0   :  { %12 = vsyncpa [#allocation3], 0  ;;  %s800_s0 = inlined_call_operand.vmem [shape: f32[16,128], index: 0, kind: input, shape index: {}]   ;;  %s801_s1 = inlined_call_operand.hbm [shape: bf16[128,128], index: 1, kind: input, shape index: {}]   ;;  %s802_s2 = inlined_call_operand.vmem [shape: f32[1,128], index: 2, kind: input, shape index: {}]   ;;  %s803_s3 = inlined_call_operand.hbm [shape: bf16[128,128], index: 3, kind: input, shape index: {}]   ;;  %s804_s4 = inlined_call_operand.vmem [shape: f32[1,128], index: 4, kind: input, shape index: {}]   ;;  %s805_s5 = inlined_call_operand.hbm [shape: bf16[128,128], index: 5, kind: input, shape index: {}]   ;;  %s806_s6 = inlined_call_operand.vmem [shape: f32[1,128], index: 6, kind: input, shape index: {}]   ;;  %s807_s7 = inlined_call_operand.vmem [shape: bf16[16,128], index: 7, kind: output, shape index: {}]  }
   0x1   :  { %13 = vsyncpa [#allocation5], 0  ;;  %s653_s24 = smov [#allocation4]   ;;  %s654_s26 = smov [#allocation2]  }
   0x2   :  { %s35_s25 = sshll.u32 %s653_s24, 4  ;;  %s21_s27 = sshll.u32 %s654_s26, 4  ;;  %s36_s25 = int_to_ptr.vmem [resolvable:$true] %s35_s25  ;;  %s700_s27 = int_to_ptr.vmem [resolvable:$true] %s21_s27 }
   0x3   :  { %s583_s30 = scalar_lea.hbm %s803_s3, 1024 }
   0x4   :  { %p584_p0 = scmp.ne.s32.totalorder %s803_s3, %s583_s30  ;;  %p587_p1 = scmp.lt.u32.totalorder %s583_s30, %s803_s3 }
   0x6   :  { %p589_p2 = pnand %p587_p1, %p584_p0 }
   0x8   :  { %592 = shalt.err (!%p589_p2)
}
   0x9   :  { %s593_s12 = scalar_lea.vmem %s36_s25, 1024  ;;  %p598_p4 = scmp.lt.s32.totalorder %s36_s25, %s36_s25 }
   0xa   :  { %p594_p3 = scmp.ne.s32.totalorder %s36_s25, %s593_s12  ;;  %p599_p5 = scmp.lt.s32.totalorder %s593_s12, %s593_s12 }
   0xc   :  { %p600_p6 = por %p599_p5, %p598_p4 }
   0xe   :  { %p601_p7 = pnand %p600_p6, %p594_p3 }
  0x10   :  { %604 = shalt.err (!%p601_p7)
}
  0x11   :  { %s655_s13 = smov 64   ;;  %s656_s14 = smov 4  }
  0x12   :  { %41 = dma.hbm_to_vmem [thread:$0]  %s803_s3, 1024, %s36_s25, [#allocation5], %s655_s13, %s655_s13, %s656_s14  }
  0x13   :  { %s605_s19 = scalar_lea.hbm %s801_s1, 1024 }
  0x14   :  { %p606_p8 = scmp.ne.s32.totalorder %s801_s1, %s605_s19  ;;  %p609_p9 = scmp.lt.u32.totalorder %s605_s19, %s801_s1 }
  0x16   :  { %p611_p10 = pnand %p609_p9, %p606_p8 }
  0x18   :  { %614 = shalt.err (!%p611_p10)
}
  0x19   :  { %s615_s24 = scalar_lea.vmem %s700_s27, 1024  ;;  %p620_p12 = scmp.lt.s32.totalorder %s700_s27, %s700_s27 }
  0x1a   :  { %p616_p11 = scmp.ne.s32.totalorder %s700_s27, %s615_s24  ;;  %p621_p13 = scmp.lt.s32.totalorder %s615_s24, %s615_s24 }
  0x1c   :  { %p622_p0 = por %p621_p13, %p620_p12 }
  0x1e   :  { %p623_p1 = pnand %p622_p0, %p616_p11 }
  0x20   :  { %626 = shalt.err (!%p623_p1)
}
  0x21   :  { %27 = dma.hbm_to_vmem [thread:$0]  %s801_s1, 1024, %s700_s27, [#allocation3], %s655_s13, %s655_s13, %s656_s14  }
  0x22   :  { %s657_s26 = smov [#allocation6]   ;;  %s627_s8 = scalar_lea.hbm %s805_s5, 1024 }
  0x23   :  { %s49_s28 = sshll.u32 %s657_s26, 4  ;;  %p628_p2 = scmp.ne.s32.totalorder %s805_s5, %s627_s8  ;;  %s50_s28 = int_to_ptr.vmem [resolvable:$true] %s49_s28 }
  0x24   :  { %p631_p3 = scmp.lt.u32.totalorder %s627_s8, %s805_s5 }
  0x26   :  { %p633_p4 = pnand %p631_p3, %p628_p2 }
  0x28   :  { %636 = shalt.err (!%p633_p4)
}
  0x29   :  { %s637_s15 = scalar_lea.vmem %s50_s28, 1024  ;;  %p642_p6 = scmp.lt.s32.totalorder %s50_s28, %s50_s28 }
  0x2a   :  { %p638_p5 = scmp.ne.s32.totalorder %s50_s28, %s637_s15  ;;  %p643_p7 = scmp.lt.s32.totalorder %s637_s15, %s637_s15 }
  0x2c   :  { %p644_p8 = por %p643_p7, %p642_p6 }
  0x2e   :  { %p645_p9 = pnand %p644_p8, %p638_p5 }
  0x30   :  { %648 = shalt.err (!%p645_p9)
}
  0x31   :  { %55 = dma.hbm_to_vmem [thread:$0]  %s805_s5, 1024, %s50_s28, [#allocation5], %s655_s13, %s655_s13, %s656_s14  }
  0x32   :  { %649 = dma.done.wait [#allocation3], 1024  }
  0x33   :  { %650 = vsyncadd [#allocation3], 4294966272 }
  0x34   :  { %651 = dma.done.wait [#allocation5], 2048  }
  0x35   :  { %652 = vsyncadd [#allocation5], 4294965248  ;;  %v658_v0 = vmov 0.0   ;;  %vm659_vm0 = vmmov 0   ;;  %v559_v1 = vld [vmem:[#allocation2] sm:$0xff]   ;;  %v560_v2 = vld [vmem:[#allocation2 + $0x8] sm:$0xff]  }
  0x36   :  { %492 = vmatprep.subr.bf16.mxu0 %v658_v0  ;;  %508 = vmatprep.mubr.msk.bf16.mxu0 %vm659_vm0, %v658_v0  ;;  %v561_v3 = vld [vmem:[#allocation2 + $0x10] sm:$0xff]   ;;  %v567_v4 = vld [vmem:[#allocation4] sm:$0xff]   ;;  %v562_v5 = vld [vmem:[#allocation2 + $0x18] sm:$0xff]  }
  0x37   :  { %512 = vmatprep.subr.bf16.mxu1 %v658_v0  ;;  %528 = vmatprep.mubr.msk.bf16.mxu1 %vm659_vm0, %v658_v0  ;;  %v568_v6 = vld [vmem:[#allocation4 + $0x8] sm:$0xff]   ;;  %v563_v7 = vld [vmem:[#allocation2 + $0x20] sm:$0xff]   ;;  %v569_v8 = vld [vmem:[#allocation4 + $0x10] sm:$0xff]  }
  0x38   :  { %493 = vmatpush3.bf16.msra.mxu0 %v559_v1  ;;  %513 = vmatpush3.bf16.msra.mxu1 %v567_v4  ;;  %v564_v9 = vld [vmem:[#allocation2 + $0x28] sm:$0xff]   ;;  %v570_v10 = vld [vmem:[#allocation4 + $0x18] sm:$0xff]   ;;  %v565_v11 = vld [vmem:[#allocation2 + $0x30] sm:$0xff]  }
  0x39   :  { %494 = vmatprep.subr.bf16.mxu0 %v658_v0  ;;  %514 = vmatprep.subr.bf16.mxu1 %v658_v0  ;;  %v571_v12 = vld [vmem:[#allocation4 + $0x20] sm:$0xff]   ;;  %v566_v13 = vld [vmem:[#allocation2 + $0x38] sm:$0xff]   ;;  %v69_v15 = vld [vmem:[%s800_s0 + $0x8] sm:$0xff] }
  0x3a   :  { %v68_v14 = vld [vmem:[%s800_s0] sm:$0xff]  ;;  %v572_v16 = vld [vmem:[#allocation4 + $0x28] sm:$0xff]   ;;  %v573_v18 = vld [vmem:[#allocation4 + $0x30] sm:$0xff]  }
  0x3b   :  { %v70_v17 = vpack.c.bf16 %v69_v15, %v68_v14  ;;  %v574_v19 = vld [vmem:[#allocation4 + $0x38] sm:$0xff]   ;;  %v575_v20 = vld [vmem:[#allocation6] sm:$0xff]   ;;  %v576_v21 = vld [vmem:[#allocation6 + $0x8] sm:$0xff]  }
  0x3c   :  { %495 = vmatpush3.bf16.msra.mxu0 %v560_v2  ;;  %515 = vmatpush3.bf16.msra.mxu1 %v568_v6  ;;  %v577_v22 = vld [vmem:[#allocation6 + $0x10] sm:$0xff]   ;;  %v578_v23 = vld [vmem:[#allocation6 + $0x18] sm:$0xff]   ;;  %v579_v24 = vld [vmem:[#allocation6 + $0x20] sm:$0xff]  }
  0x3d   :  { %496 = vmatprep.subr.bf16.mxu0 %v658_v0  ;;  %516 = vmatprep.subr.bf16.mxu1 %v658_v0  ;;  %v580_v25 = vld [vmem:[#allocation6 + $0x28] sm:$0xff]   ;;  %v429_v26 = vld [vmem:[%s802_s2] ss:$0 sm:$0xff]  ;;  %v581_v36 = vld [vmem:[#allocation6 + $0x30] sm:$0xff]  }
  0x3e   :  { %v582_v37 = vld [vmem:[#allocation6 + $0x38] sm:$0xff]   ;;  %v438_v38 = vld [vmem:[%s804_s4] ss:$0 sm:$0xff] }
  0x3f   :  { %v447_v48 = vld [vmem:[%s806_s6] ss:$0 sm:$0xff] }
  0x40   :  { %497 = vmatpush3.bf16.msra.mxu0 %v561_v3  ;;  %517 = vmatpush3.bf16.msra.mxu1 %v569_v8 }
  0x41   :  { %498 = vmatprep.subr.bf16.mxu0 %v658_v0  ;;  %518 = vmatprep.subr.bf16.mxu1 %v658_v0 }
  0x44   :  { %499 = vmatpush3.bf16.msra.mxu0 %v562_v5  ;;  %519 = vmatpush3.bf16.msra.mxu1 %v570_v10 }
  0x45   :  { %500 = vmatprep.subr.bf16.mxu0 %v658_v0  ;;  %520 = vmatprep.subr.bf16.mxu1 %v658_v0 }
  0x48   :  { %501 = vmatpush3.bf16.msra.mxu0 %v563_v7  ;;  %521 = vmatpush3.bf16.msra.mxu1 %v571_v12 }
  0x49   :  { %502 = vmatprep.subr.bf16.mxu0 %v658_v0  ;;  %522 = vmatprep.subr.bf16.mxu1 %v658_v0 }
  0x4c   :  { %503 = vmatpush3.bf16.msra.mxu0 %v564_v9  ;;  %523 = vmatpush3.bf16.msra.mxu1 %v572_v16 }
  0x4d   :  { %504 = vmatprep.subr.bf16.mxu0 %v658_v0  ;;  %524 = vmatprep.subr.bf16.mxu1 %v658_v0 }
  0x50   :  { %505 = vmatpush3.bf16.msra.mxu0 %v565_v11  ;;  %525 = vmatpush3.bf16.msra.mxu1 %v573_v18 }
  0x51   :  { %506 = vmatprep.subr.bf16.mxu0 %v658_v0  ;;  %526 = vmatprep.subr.bf16.mxu1 %v658_v0 }
  0x54   :  { %507 = vmatpush3.bf16.msra.mxu0 %v566_v13  ;;  %527 = vmatpush3.bf16.msra.mxu1 %v574_v19 }
  0x55   :  { %532 = vmatprep.subr.bf16.mxu0 %v658_v0 }
  0x57   :  { %509 = vmatmul.mubr.bf16.vlgmr.msra.gmra.mrb[0].mxu0 %v70_v17 }
  0x58   :  { %548 = vmatprep.mubr.msk.bf16.mxu0 %vm659_vm0, %v658_v0  ;;  %533 = vmatpush3.bf16.msra.mxu0 %v575_v20 }
  0x59   :  { %534 = vmatprep.subr.bf16.mxu0 %v658_v0 }
  0x5c   :  { %535 = vmatpush3.bf16.msra.mxu0 %v576_v21 }
  0x5d   :  { %536 = vmatprep.subr.bf16.mxu0 %v658_v0 }
  0x60   :  { %537 = vmatpush3.bf16.msra.mxu0 %v577_v22 }
  0x61   :  { %538 = vmatprep.subr.bf16.mxu0 %v658_v0 }
  0x64   :  { %539 = vmatpush3.bf16.msra.mxu0 %v578_v23 }
  0x65   :  { %540 = vmatprep.subr.bf16.mxu0 %v658_v0 }
  0x68   :  { %541 = vmatpush3.bf16.msra.mxu0 %v579_v24 }
  0x69   :  { %542 = vmatprep.subr.bf16.mxu0 %v658_v0 }
  0x6c   :  { %543 = vmatpush3.bf16.msra.mxu0 %v580_v25 }
  0x6d   :  { %544 = vmatprep.subr.bf16.mxu0 %v658_v0 }
  0x70   :  { %545 = vmatpush3.bf16.msra.mxu0 %v581_v36 }
  0x71   :  { %546 = vmatprep.subr.bf16.mxu0 %v658_v0 }
  0x74   :  { %547 = vmatpush3.bf16.msra.mxu0 %v582_v37 }
 0x12a   :  { %v176_v27 = vpop.f32.mrb[0].mxu0 }
 0x12b   :  { %v177_v28 = vadd.f32 %v429_v26, %v176_v27  ;;  %v510_v29 = vpop.f32.mrb[1].mxu0 }
 0x12c   :  { %v179_v30 = vpop.f32.mrb[2].mxu0 }
 0x12d   :  { %v180_v31 = vadd.f32 %v429_v26, %v179_v30  ;;  %v511_v32 = vpop.f32.mrb[3].mxu0  ;;  %v183_v33 = vmax.f32 %v177_v28, 0.0 }
 0x12f   :  { %v184_v34 = vmax.f32 %v180_v31, 0.0 }
 0x131   :  { %v185_v35 = vpack.c.bf16 %v184_v34, %v183_v33 }
 0x133   :  { %529 = vmatmul.mubr.bf16.vlgmr.msra.gmra.mrb[0].mxu1 %v185_v35 }
 0x206   :  { %v291_v39 = vpop.f32.mrb[0].mxu1 }
 0x207   :  { %v292_v40 = vadd.f32 %v438_v38, %v291_v39  ;;  %v530_v41 = vpop.f32.mrb[1].mxu1 }
 0x208   :  { %v294_v42 = vpop.f32.mrb[2].mxu1 }
 0x209   :  { %v295_v43 = vadd.f32 %v438_v38, %v294_v42  ;;  %v531_v44 = vpop.f32.mrb[3].mxu1  ;;  %v298_v45 = vmax.f32 %v292_v40, 0.0 }
 0x20b   :  { %v299_v46 = vmax.f32 %v295_v43, 0.0 }
 0x20d   :  { %v300_v47 = vpack.c.bf16 %v299_v46, %v298_v45 }
 0x20f   :  { %549 = vmatmul.mubr.bf16.vlgmr.msra.gmra.mrb[4].mxu0 %v300_v47 }
 0x2e2   :  { %v406_v49 = vpop.f32.mrb[4].mxu0 }
 0x2e3   :  { %v550_v50 = vpop.f32.mrb[5].mxu0  ;;  %v407_v52 = vadd.f32 %v447_v48, %v406_v49 }
 0x2e4   :  { %v409_v51 = vpop.f32.mrb[6].mxu0 }
 0x2e5   :  { %v410_v53 = vadd.f32 %v447_v48, %v409_v51  ;;  %v551_v54 = vpop.f32.mrb[7].mxu0 }
 0x2e7   :  { %v463_v55 = vpack.c.bf16 %v410_v53, %v407_v52 }
 0x2e9   :  { %464 = vst [vmem:[%s807_s7] sm:$0xff] %v463_v55  }
 0x2ea   :  { %427 = vsyncpa [#allocation3], 1 }
 0x2eb   :  { %428 = vsyncpa [#allocation5], 1 }

</bundles_post_ra>
